<compile_context>
chip_gen: v5e
topology: v5e:2x2
jax: 0.10.0
libtpu: 0.0.40
codegen_flags: <defaults>
</compile_context>

<pallas_src>
import jax
import jax.numpy as jnp
from jax.experimental import pallas as pl
from jax.experimental.pallas import tpu as pltpu


def _round_up(a, b):
    return ((a + b - 1) // b) * b


def _vmem_budget_bytes():
    """(scratch budget, vmem_limit_bytes) — generation aware."""
    cap = None
    try:
        cap = getattr(pltpu.get_tpu_info(), "vmem_capacity_bytes", None)
    except Exception:
        cap = None
    if cap is None:
        cap = 64 * 1024 * 1024                    # conservative: assume v7x
    if cap >= 96 * 1024 * 1024:                   # v5e / v6e: 128 MiB physical
        return 88 * 1024 * 1024, 100 * 1024 * 1024
    return 36 * 1024 * 1024, 48 * 1024 * 1024     # v7x: 64 MiB physical


def _conv_bn_silu_kernel(p_ref, w_ref, b_ref, o_ref, acc_ref):
    """Grid = (M tiles, N tiles, K tiles); K (contraction) is innermost.

    acc_ref: (tm, tn) f32 accumulator, resident across the K sweep (output block
    index is independent of K). Bias + SiLU happen once, at the last K step.
    """
    @pl.when(pl.program_id(2) == 0)
    def _init():
        acc_ref[...] = jnp.zeros_like(acc_ref)

    acc_ref[...] += jnp.dot(p_ref[...], w_ref[...],
                            preferred_element_type=jnp.float32)

    @pl.when(pl.program_id(2) == pl.num_programs(2) - 1)
    def _finalize():
        y = acc_ref[...] + b_ref[...]        # folded BN bias (scale already in W)
        y = y * jax.nn.sigmoid(y)            # SiLU in f32 (VPU/EUP)
        # Output block may be narrower than the accumulator (small-Cout layers
        # store only the real Cout lanes -> masked vst, far fewer HBM bytes).
        o_ref[...] = y[:, : o_ref.shape[1]].astype(o_ref.dtype)


def conv_bn_silu(x_nchw, weight_oihw, gamma, beta, running_mean, running_var,
                 *, stride=2, padding=1, eps=1e-3,
                 compute_dtype=jnp.bfloat16, out_dtype=None,
                 tm=None, tn_max=512, tk_max=1024):
    """Forward pass of the PyTorch `Conv` module (inference BN semantics)."""
    n, cin, h, w = x_nchw.shape
    cout, cin_w, kh, kw = weight_oihw.shape
    assert cin == cin_w
    assert tn_max % 128 == 0 and tk_max % 128 == 0
    if out_dtype is None:
        out_dtype = compute_dtype

    ho = (h + 2 * padding - kh) // stride + 1
    wo = (w + 2 * padding - kw) // stride + 1
    m = n * ho * wo
    kdim = kh * kw * cin

    # ---- glue: NCHW -> NHWC, pad, im2col (built directly in compute_dtype) ----
    x = jnp.transpose(x_nchw, (0, 2, 3, 1)).astype(compute_dtype)   # (N,H,W,Cin)
    x = jnp.pad(x, ((0, 0), (padding, padding), (padding, padding), (0, 0)))
    taps = []
    for i in range(kh):
        for j in range(kw):
            taps.append(x[:, i:i + stride * ho:stride, j:j + stride * wo:stride, :])
    patches = jnp.stack(taps, axis=3).reshape(m, kdim)               # (M, Kh*Kw*Cin)

    # weight (Cout,Cin,Kh,Kw) -> (Kh*Kw*Cin, Cout); BN scale folded in f32.
    w_mat = jnp.transpose(weight_oihw.astype(jnp.float32), (2, 3, 1, 0)).reshape(kdim, cout)
    scale = gamma.astype(jnp.float32) / jnp.sqrt(running_var.astype(jnp.float32) + eps)
    w_mat = w_mat * scale[None, :]
    bias = beta.astype(jnp.float32) - running_mean.astype(jnp.float32) * scale

    # ---- tiling ---------------------------------------------------------------
    in_elem = jnp.dtype(compute_dtype).itemsize
    out_elem = jnp.dtype(out_dtype).itemsize
    k_mult = 16 if in_elem == 2 else 8        # bf16 packs 16 rows per sublane pair

    # K tiling: single tile may be just sublane-padded (== full dim); multiple
    # K tiles must be 128-multiples (K is the lane dim of the patch block).
    if kdim <= tk_max:
        grid_k, tk = 1, _round_up(kdim, k_mult)
    else:
        grid_k = pl.cdiv(kdim, tk_max)
        tk = _round_up(pl.cdiv(kdim, grid_k), 128)
    k_pad = tk * grid_k

    # N (Cout) tiling: lane-dense 128-multiples (>=256 where Cout allows).
    n_pad128 = _round_up(cout, 128)
    grid_n = pl.cdiv(n_pad128, tn_max)
    tn = _round_up(pl.cdiv(n_pad128, grid_n), 128)
    n_pad = tn * grid_n

    # Output width: keep true Cout when one N tile covers it (kills the 8->128
    # lane write amplification of small-Cout layers); lane-dense otherwise.
    out_cols = cout if grid_n == 1 else n_pad
    tn_out = out_cols if grid_n == 1 else tn

    # Generation-aware VMEM budget and M tile.
    vmem_budget, vmem_limit = _vmem_budget_bytes()
    tm_max = 1024 if vmem_budget >= 64 * 1024 * 1024 else 512
    if tm is None:
        # >= 4 M-steps so both v7x TensorCores get >= 2 pipelined steps.
        tm = min(tm_max, max(8, _round_up(pl.cdiv(m, 4), 8)))
    else:
        tm = max(8, _round_up(tm, 8))

    def _vmem_bytes(tm_):
        lane = lambda v: _round_up(v, 128)            # VMEM tiles are lane-padded
        return (2 * tm_ * lane(tk) * in_elem          # patch tile, double-buffered
                + 2 * _round_up(tk, 8) * lane(tn) * in_elem   # weight tile x2 bufs
                + 2 * 8 * lane(tn) * 4                # bias (sublane-padded)
                + 2 * tm_ * lane(tn_out) * out_elem   # output tile, double-buffered
                + tm_ * lane(tn) * 4)                 # f32 accumulator scratch
    while tm > 8 and _vmem_bytes(tm) > vmem_budget:   # safety net; rarely triggers
        tm = max(8, _round_up(tm // 2, 8))

    m_pad = _round_up(m, tm)

    patches = jnp.pad(patches, ((0, m_pad - m), (0, k_pad - kdim)))
    w_padded = jnp.pad(w_mat, ((0, k_pad - kdim), (0, n_pad - cout))).astype(compute_dtype)
    bias_padded = jnp.pad(bias, (0, n_pad - cout)).reshape(1, n_pad).astype(jnp.float32)

    # ---- Pallas kernel: tiled matmul + folded BN bias + SiLU -------------------
    out_flat = pl.pallas_call(
        _conv_bn_silu_kernel,
        out_shape=jax.ShapeDtypeStruct((m_pad, out_cols), out_dtype),
        grid_spec=pltpu.PrefetchScalarGridSpec(
            num_scalar_prefetch=0,
            grid=(m_pad // tm, grid_n, grid_k),
            in_specs=[
                pl.BlockSpec((tm, tk), lambda i, j, k: (i, k)),
                pl.BlockSpec((tk, tn), lambda i, j, k: (k, j)),
                pl.BlockSpec((1, tn), lambda i, j, k: (0, j)),
            ],
            out_specs=pl.BlockSpec((tm, tn_out), lambda i, j, k: (i, j)),
            scratch_shapes=[pltpu.VMEM((tm, tn), jnp.float32)],
        ),
        compiler_params=pltpu.CompilerParams(
            dimension_semantics=("parallel", "parallel", "arbitrary"),
            vmem_limit_bytes=vmem_limit),
    )(patches, w_padded, bias_padded)

    # ---- glue: (Mpad, out_cols) -> (M, Cout) -> NCHW ---------------------------
    out = out_flat[:m, :cout].reshape(n, ho, wo, cout)
    return jnp.transpose(out, (0, 3, 1, 2))


def _reference(x_nchw, weight_oihw, gamma, beta, running_mean, running_var,
               *, stride=2, padding=1, eps=1e-3):
    y = jax.lax.conv_general_dilated(
        x_nchw.astype(jnp.float32), weight_oihw.astype(jnp.float32),
        window_strides=(stride, stride),
        padding=((padding, padding), (padding, padding)),
        dimension_numbers=("NCHW", "OIHW", "NCHW"))
    scale = (gamma / jnp.sqrt(running_var + eps)).reshape(1, -1, 1, 1)
    bias = (beta - running_mean * gamma / jnp.sqrt(running_var + eps)).reshape(1, -1, 1, 1)
    y = y * scale + bias
    return y * jax.nn.sigmoid(y)


def _make_params(key, cin, cout, k):
    k_w, k_g, k_b, k_m, k_v = jax.random.split(key, 5)
    weight = jax.random.normal(k_w, (cout, cin, k, k), dtype=jnp.float32) * 0.1
    gamma = jax.random.normal(k_g, (cout,), dtype=jnp.float32) * 0.1 + 1.0
    beta = jax.random.normal(k_b, (cout,), dtype=jnp.float32) * 0.1
    mean = jax.random.normal(k_m, (cout,), dtype=jnp.float32) * 0.1
    var = jnp.abs(jax.random.normal(k_v, (cout,), dtype=jnp.float32)) * 0.1 + 1.0
    return weight, gamma, beta, mean, var


if __name__ == "__main__":
    key = jax.random.PRNGKey(0)
    k1, k2, k3, k4 = jax.random.split(key, 4)

    # ---- Test 1: stem-like Conv(4->8, k3 s2 p1) on (2, 4, 16, 16) --------------
    N, Cin, H, W, Cout, K = 2, 4, 16, 16, 8, 3
    x = jax.random.normal(k1, (N, Cin, H, W), dtype=jnp.float32)
    wgt, g, b, mu, var = _make_params(k2, Cin, Cout, K)
    ref = _reference(x, wgt, g, b, mu, var, stride=2, padding=1)

    out_f32 = conv_bn_silu(x, wgt, g, b, mu, var, stride=2, padding=1,
                           compute_dtype=jnp.float32)
    out_f32 = jax.block_until_ready(out_f32)
    assert out_f32.shape == (N, Cout, H // 2, W // 2), out_f32.shape
    assert jnp.allclose(out_f32, ref, atol=1e-4, rtol=1e-4), \
        float(jnp.max(jnp.abs(out_f32 - ref)))

    out_bf16 = conv_bn_silu(x, wgt, g, b, mu, var, stride=2, padding=1,
                            compute_dtype=jnp.bfloat16)
    out_bf16 = jax.block_until_ready(out_bf16)
    assert out_bf16.shape == (N, Cout, H // 2, W // 2), out_bf16.shape
    assert jnp.allclose(out_bf16.astype(jnp.float32), ref, atol=5e-2, rtol=5e-2), \
        float(jnp.max(jnp.abs(out_bf16.astype(jnp.float32) - ref)))

    # ---- Test 2: force the K/N-tiled accumulator path (grid_k=2, grid_n=2) -----
    N2, Cin2, H2, W2, Cout2 = 1, 16, 8, 8, 160
    x2 = jax.random.normal(k3, (N2, Cin2, H2, W2), dtype=jnp.float32)
    wgt2, g2, b2, mu2, var2 = _make_params(k4, Cin2, Cout2, 3)
    ref2 = _reference(x2, wgt2, g2, b2, mu2, var2, stride=1, padding=1)

    out2 = conv_bn_silu(x2, wgt2, g2, b2, mu2, var2, stride=1, padding=1,
                        compute_dtype=jnp.float32, tn_max=128, tk_max=128)
    out2 = jax.block_until_ready(out2)
    assert out2.shape == (N2, Cout2, H2, W2), out2.shape
    assert jnp.allclose(out2, ref2, atol=5e-4, rtol=5e-4), \
        float(jnp.max(jnp.abs(out2 - ref2)))

    print("KERNEL_OK")
</pallas_src>

<mosaic_0001>
module attributes {stable_mosaic.version = 11 : i64} {
  func.func @_conv_bn_silu_kernel(%arg0: i32, %arg1: i32, %arg2: i32, %arg3: memref<32x40xf32, #tpu.memory_space<vmem>>, %arg4: memref<40x128xf32, #tpu.memory_space<vmem>>, %arg5: memref<1x128xf32, #tpu.memory_space<vmem>>, %arg6: memref<32x8xf32, #tpu.memory_space<vmem>>, %arg7: memref<32x128xf32, #tpu.memory_space<vmem>>) attributes {dimension_semantics = [#tpu.dimension_semantics<parallel>, #tpu.dimension_semantics<parallel>, #tpu.dimension_semantics<arbitrary>], iteration_bounds = array<i64: 4, 1, 1>, scalar_prefetch = 0 : i64, scratch_operands = 1 : i64, tpu.core_type = #tpu.core_type<tc>, window_params = [{transform_indices = @transform_0, window_bounds = array<i64: 32, 40>}, {transform_indices = @transform_1, window_bounds = array<i64: 40, 128>}, {transform_indices = @transform_2, window_bounds = array<i64: 1, 128>}, {transform_indices = @transform_3, window_bounds = array<i64: 32, 8>}]} {
    %c0_i32 = arith.constant 0 : i32
    %0 = arith.cmpi eq, %arg2, %c0_i32 : i32
    %1 = arith.extui %0 : i1 to i32
    %c0_i32_0 = arith.constant 0 : i32
    %2 = arith.cmpi ne, %1, %c0_i32_0 : i32
    scf.if %2 {
      %cst_10 = arith.constant 0.000000e+00 : f32
      %12 = vector.broadcast %cst_10 : f32 to vector<32x128xf32>
      %c0_11 = arith.constant 0 : index
      %c0_12 = arith.constant 0 : index
      %13 = vector.load %arg7[%c0_11, %c0_12] : memref<32x128xf32, #tpu.memory_space<vmem>>, vector<32x128xf32>
      tpu.vector_store %arg7[%c0_11, %c0_12], %12 {strides = array<i32>} : memref<32x128xf32, #tpu.memory_space<vmem>>, vector<32x128xf32>,
    } else {
    }
    %c0 = arith.constant 0 : index
    %c0_1 = arith.constant 0 : index
    %3 = vector.load %arg7[%c0, %c0_1] : memref<32x128xf32, #tpu.memory_space<vmem>>, vector<32x128xf32>
    %c0_2 = arith.constant 0 : index
    %c0_3 = arith.constant 0 : index
    %4 = vector.load %arg3[%c0_2, %c0_3] : memref<32x40xf32, #tpu.memory_space<vmem>>, vector<32x40xf32>
    %c0_4 = arith.constant 0 : index
    %c0_5 = arith.constant 0 : index
    %5 = vector.load %arg4[%c0_4, %c0_5] : memref<40x128xf32, #tpu.memory_space<vmem>>, vector<40x128xf32>
    %cst = arith.constant dense<0.000000e+00> : vector<32x128xf32>
    %6 = tpu.matmul %4, %5, %cst {dimension_numbers = #tpu.dot_dimension_numbers<[1], [0], [0], [1], [0, 0, 1, 1], [], []>} : vector<32x40xf32>, vector<40x128xf32>, vector<32x128xf32> -> vector<32x128xf32>
    %7 = arith.addf %3, %6 : vector<32x128xf32>
    %c0_6 = arith.constant 0 : index
    %c0_7 = arith.constant 0 : index
    %8 = vector.load %arg7[%c0_6, %c0_7] : memref<32x128xf32, #tpu.memory_space<vmem>>, vector<32x128xf32>
    tpu.vector_store %arg7[%c0_6, %c0_7], %7 {strides = array<i32>} : memref<32x128xf32, #tpu.memory_space<vmem>>, vector<32x128xf32>,
    %c0_i32_8 = arith.constant 0 : i32
    %9 = arith.cmpi eq, %arg2, %c0_i32_8 : i32
    %10 = arith.extui %9 : i1 to i32
    %c0_i32_9 = arith.constant 0 : i32
    %11 = arith.cmpi ne, %10, %c0_i32_9 : i32
    scf.if %11 {
      %c0_10 = arith.constant 0 : index
      %c0_11 = arith.constant 0 : index
      %12 = vector.load %arg7[%c0_10, %c0_11] : memref<32x128xf32, #tpu.memory_space<vmem>>, vector<32x128xf32>
      %c0_12 = arith.constant 0 : index
      %c0_13 = arith.constant 0 : index
      %13 = vector.load %arg5[%c0_12, %c0_13] : memref<1x128xf32, #tpu.memory_space<vmem>>, vector<1x128xf32>
      %14 = vector.broadcast %13 : vector<1x128xf32> to vector<32x128xf32>
      %15 = arith.addf %12, %14 : vector<32x128xf32>
      %16 = arith.negf %15 : vector<32x128xf32>
      %17 = math.exp %16 : vector<32x128xf32>
      %cst_14 = arith.constant 1.000000e+00 : f32
      %18 = vector.broadcast %cst_14 : f32 to vector<32x128xf32>
      %19 = arith.addf %18, %17 : vector<32x128xf32>
      %20 = arith.divf %18, %19 : vector<32x128xf32>
      %21 = arith.mulf %15, %20 : vector<32x128xf32>
      %22 = vector.extract_strided_slice %21 {offsets = [0, 0], sizes = [32, 8], strides = [1, 1]} : vector<32x128xf32> to vector<32x8xf32>
      %c0_15 = arith.constant 0 : index
      %c0_16 = arith.constant 0 : index
      %23 = vector.load %arg6[%c0_15, %c0_16] : memref<32x8xf32, #tpu.memory_space<vmem>>, vector<32x8xf32>
      tpu.vector_store %arg6[%c0_15, %c0_16], %22 {strides = array<i32>} : memref<32x8xf32, #tpu.memory_space<vmem>>, vector<32x8xf32>,
    } else {
    }
    return
  }
  func.func @transform_0(%arg0: i32, %arg1: i32, %arg2: i32) -> (i32, i32) {
    %c0_i32 = arith.constant 0 : i32
    return %arg0, %arg2 : i32, i32
  }
  func.func @transform_1(%arg0: i32, %arg1: i32, %arg2: i32) -> (i32, i32) {
    %c0_i32 = arith.constant 0 : i32
    return %arg2, %arg1 : i32, i32
  }
  func.func @transform_2(%arg0: i32, %arg1: i32, %arg2: i32) -> (i32, i32) {
    %c0_i32 = arith.constant 0 : i32
    %c0_i32_0 = arith.constant 0 : i32
    return %c0_i32, %arg1 : i32, i32
  }
  func.func @transform_3(%arg0: i32, %arg1: i32, %arg2: i32) -> (i32, i32) {
    %c0_i32 = arith.constant 0 : i32
    return %arg0, %arg1 : i32, i32
  }
}

</mosaic_0001>

<bundles_post_ra>
// kernel: tpu_custom_call.1
= control target key start
LH: loop header
LB: loop body
LE: loop exit
PB: predicated region body
PF: predicated region fallthrough
CT: control target
= control target key end

     0   :  { %s662_s12 = smov 0   ;;  %s664_s13 = smov 0   ;;  %s749_s0 = inlined_call_operand.vmem [shape: f32[128,40], index: 0, kind: input, shape index: {}]   ;;  %s750_s1 = inlined_call_operand.vmem [shape: f32[40,128], index: 1, kind: input, shape index: {}]   ;;  %s751_s2 = inlined_call_operand.vmem [shape: f32[1,128], index: 2, kind: input, shape index: {}]   ;;  %s752_s3 = inlined_call_operand.vmem [shape: f32[128,8], index: 3, kind: output, shape index: {}]  }
   0x1   :  { %s666_s14 = smov 0  }
   0x2 LB: > { %s32_s15 = sadd.s32 1, %s636_s13  ;;  %p547_p0 = scmp.ge.s32.totalorder %s640_s14, 1  ;;  %s640_s14 = sphi %s666_s14, %s13_s14   ;;  %s636_s13 = sphi %s664_s13, %s754_s13   ;;  %s632_s12 = sphi %s662_s12, %s753_s12  }
   0x3   : > { %p34_p1 = scmp.ge.s32.totalorder %s32_s15, 4  ;;  %p188_p2 = scmp.lt.s32.totalorder %s640_s14, 5 }
   0x5   : > { %s756_s15 = smov (%p34_p1, %s32_s15), 0  ;;  %p189_p3 = pnand %p547_p0, %p188_p2 }
   0x6   : > { %s548_s20 = sshll.u32 (!%p189_p3), %s632_s12, 2 }
   0x7   : > { %192 = sbr.rel (%p189_p3) target bundleno = 190 (0xbe), region = 32  ;;  %p230_p4 = scmp.lt.s32.totalorder (!%p189_p3), %s548_s20, 15 }
   0xc   : > { %v279_v0 = vld [vmem:[%s750_s1 + $0x20] sm:$0xff]  ;;  %v278_v1 = vld [vmem:[%s750_s1 + $0x18] sm:$0xff]  ;;  %v277_v2 = vld [vmem:[%s750_s1 + $0x10] sm:$0xff]  ;;  %s758_s20 = smov (!%p230_p4, %s548_s20), 15  ;;  %vm280_vm0 = vcmask 326656   ;;  %vm425_vm6 = vcmask 64512  }
   0xd   : > { %304 = vmatpush.msra.mxu0 %v279_v0  ;;  %562 = vmatpush.msra.mxu1 %v279_v0  ;;  %v276_v3 = vld [vmem:[%s750_s1 + $0x8] sm:$0xff]  ;;  %s549_s25 = sshll.u32 %s758_s20, 3  ;;  %v275_v4 = vld [vmem:[%s750_s1] sm:$0xff] }
   0xe   : > { %563 = vmatpush.msra.mxu2 %v279_v0  ;;  %564 = vmatpush.msra.mxu3 %v279_v0  ;;  %s236_s30 = scalar_lea.vmem %s749_s0, %s549_s25  ;;  %v601_v9 = vld [vmem:[%s751_s2] ss:$0 sm:$0xff]  ;;  %s723_s8 = scalar_lea.vmem %s752_s3, %s549_s25 }
   0xf   : > { %305 = vmatpush.msra.mxu0 %v278_v1  ;;  %565 = vmatpush.msra.mxu1 %v278_v1  ;;  %v271_v5 = vld [vmem:[%s236_s30] sm:$0xff]  ;;  %v272_v6 = vld [vmem:[%s236_s30 + $0x8] sm:$0xff]  ;;  %v273_v7 = vld [vmem:[%s236_s30 + $0x10] sm:$0xff] }
  0x10   : > { %566 = vmatpush.msra.mxu2 %v278_v1  ;;  %567 = vmatpush.msra.mxu3 %v278_v1  ;;  %v274_v8 = vld [vmem:[%s236_s30 + $0x18] sm:$0xff] }
  0x11   : > { %306 = vmatpush.msra.mxu0 %v277_v2  ;;  %568 = vmatpush.msra.mxu1 %v277_v2 }
  0x12   : > { %569 = vmatpush.msra.mxu2 %v277_v2  ;;  %570 = vmatpush.msra.mxu3 %v277_v2 }
  0x13   : > { %307 = vmatpush.msra.mxu0 %v276_v3  ;;  %571 = vmatpush.msra.mxu1 %v276_v3 }
  0x14   : > { %572 = vmatpush.msra.mxu2 %v276_v3  ;;  %573 = vmatpush.msra.mxu3 %v276_v3 }
  0x15   : > { %308 = vmatpush.msra.mxu0 %v275_v4  ;;  %574 = vmatpush.msra.mxu1 %v275_v4 }
  0x16   : > { %575 = vmatpush.msra.mxu2 %v275_v4  ;;  %576 = vmatpush.msra.mxu3 %v275_v4 }
  0x17   : > { %552 = vmatmul.msk.f32.vlgmr.msra.gmra.mxu0 %vm280_vm0, %v271_v5  ;;  %553 = vmatmul.msk.f32.vlgmr.msra.gmra.mxu1 %vm280_vm0, %v272_v6 }
  0x18   : > { %554 = vmatmul.msk.f32.vlgmr.msra.gmra.mxu2 %vm280_vm0, %v273_v7  ;;  %555 = vmatmul.msk.f32.vlgmr.msra.gmra.mxu3 %vm280_vm0, %v274_v8 }
  0x94   : > { %v310_v10 = vpop.f32.mrf.mxu0  ;;  %v313_v11 = vpop.f32.mrf.mxu1 }
  0x95   : > { %v341_v12 = vadd.f32 %v601_v9, %v310_v10  ;;  %v706_v13 = vadd.f32 %v601_v9, %v313_v11 }
  0x97   : > { %v556_v14 = vmul.f32 -1.442695, %v341_v12  ;;  %v557_v15 = vmul.f32 -1.442695, %v706_v13 }
  0x99   : > { %602 = vpow2.f32 %v556_v14 }
  0x9a   : > { %604 = vpow2.f32 %v557_v15 }
  0x9b   : > { %v316_v16 = vpop.f32.mrf.mxu2  ;;  %v319_v17 = vpop.f32.mrf.mxu3 }
  0x9c   : > { %v709_v18 = vadd.f32 %v601_v9, %v316_v16  ;;  %v711_v19 = vadd.f32 %v601_v9, %v319_v17 }
  0x9e   : > { %v558_v20 = vmul.f32 -1.442695, %v709_v18  ;;  %v559_v21 = vmul.f32 -1.442695, %v711_v19 }
  0x9f   : > { %v603_v22 = vpop.eup %602 }
  0xa0   : > { %v605_v23 = vpop.eup %604  ;;  %v357_v24 = vadd.f32 1.0, %v603_v22  ;;  %606 = vpow2.f32 %v558_v20 }
  0xa1   : > { %v358_v25 = vadd.f32 1.0, %v605_v23  ;;  %608 = vpow2.f32 %v559_v21 }
  0xa2   : > { %610 = vrcp.f32 %v357_v24  ;;  %vm366_vm1 = vweird.f32 %v357_v24  ;;  %v370_v35 = vand.u32 2147483647, %v357_v24  ;;  %v372_v36 = vand.u32 2147483648, %v357_v24 }
  0xa3   : > { %612 = vrcp.f32 %v358_v25  ;;  %v385_v39 = vand.u32 2147483647, %v358_v25  ;;  %v387_v40 = vand.u32 2147483648, %v358_v25  ;;  %vm381_vm3 = vweird.f32 %v358_v25 }
  0xa4   : > { %v373_v44 = vor.u32 1.1754944e-38, %v372_v36  ;;  %vm371_vm7 = vcmp.eq.f32.partialorder %v370_v35, 8.507059e+37 }
  0xa5   : > { %vm386_vm9 = vcmp.eq.f32.partialorder %v385_v39, 8.507059e+37  ;;  %v388_v49 = vor.u32 1.1754944e-38, %v387_v40 }
  0xa6   : > { %v607_v26 = vpop.eup %606 }
  0xa7   : > { %v609_v27 = vpop.eup %608  ;;  %v359_v28 = vadd.f32 1.0, %v607_v26 }
  0xa8   : > { %v611_v29 = vpop.eup %610  ;;  %v715_v30 = vadd.f32 1.0, %v609_v27 }
  0xa9   : > { %v613_v31 = vpop.eup %612  ;;  %v362_v32 = vmul.f32 %v611_v29, %v357_v24  ;;  %614 = vrcp.f32 %v359_v28  ;;  %vm367_vm2 = vweird.f32 %v611_v29  ;;  %v400_v56 = vand.u32 2147483647, %v359_v28 }
  0xaa   : > { %v377_v33 = vmul.f32 %v613_v31, %v358_v25  ;;  %616 = vrcp.f32 %v715_v30  ;;  %vm382_vm4 = vweird.f32 %v613_v31  ;;  %vm368_vm5 = vmor %vm366_vm1, %vm367_vm2  ;;  %v402_v57 = vand.u32 2147483648, %v359_v28 }
  0xab   : > { %v363_v34 = vsub.f32 1.0, %v362_v32  ;;  %vm383_vm8 = vmor %vm381_vm3, %vm382_vm4  ;;  %vm396_vm11 = vweird.f32 %v359_v28  ;;  %v417_v61 = vand.u32 2147483648, %v715_v30  ;;  %v415_v0 = vand.u32 2147483647, %v715_v30 }
  0xac   : > { %v378_v37 = vsub.f32 1.0, %v377_v33  ;;  %v403_v1 = vor.u32 1.1754944e-38, %v402_v57  ;;  %vm401_vm14 = vcmp.eq.f32.partialorder %v400_v56, 8.507059e+37  ;;  %vm411_vm15 = vweird.f32 %v715_v30 }
  0xad   : > { %v364_v38 = vmul.f32 %v611_v29, %v363_v34  ;;  %v418_v5 = vor.u32 1.1754944e-38, %v417_v61  ;;  %vm416_vm1 = vcmp.eq.f32.partialorder %v415_v0, 8.507059e+37 }
  0xae   : > { %v379_v41 = vmul.f32 %v613_v31, %v378_v37 }
  0xaf   : > { %v615_v42 = vpop.eup %614  ;;  %v365_v43 = vadd.f32 %v611_v29, %v364_v38 }
  0xb0   : > { %v380_v45 = vadd.f32 %v613_v31, %v379_v41  ;;  %v392_v46 = vmul.f32 %v615_v42, %v359_v28  ;;  %v617_v47 = vpop.eup %616  ;;  %vm397_vm10 = vweird.f32 %v615_v42 }
  0xb1   : > { %v369_v48 = vsel %vm368_vm5, %v611_v29, %v365_v43  ;;  %v407_v53 = vmul.f32 %v617_v47, %v715_v30  ;;  %vm412_vm12 = vweird.f32 %v617_v47  ;;  %vm398_vm13 = vmor %vm396_vm11, %vm397_vm10 }
  0xb2   : > { %v374_v50 = vsel %vm371_vm7, %v373_v44, %v369_v48  ;;  %v384_v51 = vsel %vm383_vm8, %v613_v31, %v380_v45  ;;  %v393_v52 = vsub.f32 1.0, %v392_v46  ;;  %vm413_vm0 = vmor %vm411_vm15, %vm412_vm12 }
  0xb3   : > { %v421_v54 = vmul.f32 %v374_v50, %v341_v12  ;;  %v389_v55 = vsel %vm386_vm9, %v388_v49, %v384_v51  ;;  %v408_v60 = vsub.f32 1.0, %v407_v53 }
  0xb4   : > { %v422_v58 = vmul.f32 %v389_v55, %v706_v13  ;;  %v394_v59 = vmul.f32 %v615_v42, %v393_v52 }
  0xb5   : > { %426 = vst.msk [vmem:[%s723_s8] sm:$0xff] %vm425_vm6, %v421_v54  ;;  %v409_v63 = vmul.f32 %v617_v47, %v408_v60 }
  0xb6   : > { %427 = vst.msk [vmem:[%s723_s8 + $0x8] sm:$0xff] %vm425_vm6, %v422_v58  ;;  %v395_v62 = vadd.f32 %v615_v42, %v394_v59 }
  0xb7   : > { %v410_v3 = vadd.f32 %v617_v47, %v409_v63 }
  0xb8   : > { %v399_v2 = vsel %vm398_vm13, %v615_v42, %v395_v62 }
  0xb9   : > { %v404_v4 = vsel %vm401_vm14, %v403_v1, %v399_v2  ;;  %v414_v7 = vsel %vm413_vm0, %v617_v47, %v410_v3 }
  0xba   : > { %v423_v6 = vmul.f32 %v404_v4, %v709_v18  ;;  %v419_v8 = vsel %vm416_vm1, %v418_v5, %v414_v7 }
  0xbb   : > { %v424_v9 = vmul.f32 %v419_v8, %v711_v19 }
  0xbc   : > { %428 = vst.msk [vmem:[%s723_s8 + $0x10] sm:$0xff] %vm425_vm6, %v423_v6 }
  0xbd   : > { %429 = vst.msk [vmem:[%s723_s8 + $0x18] sm:$0xff] %vm425_vm6, %v424_v9 }
  0xbe PF: > { %s13_s14 = sadd.s32 1, %s640_s14   ;;  %s753_s12 = smov %s636_s13 }
  0xbf   : > { %p10_p5 = scmp.ge.s32.totalorder %s13_s14, 6   ;;  %s754_s13 = smov %s756_s15 }
  0xc1   :  { %12 = sbr.rel (!%p10_p5) target bundleno = 2 (0x2), region = 76 }

</bundles_post_ra>
